<compile_context>
chip_gen: v5e
topology: v5e:2x2
jax: 0.10.0
libtpu: 0.0.40
codegen_flags: <defaults>
</compile_context>

<pallas_src>
import functools
import math

import jax
import jax.numpy as jnp
from jax.experimental import pallas as pl
from jax.experimental.pallas import tpu as pltpu

HIDDEN_DIM = 64      # fixed by `hidden_dim = 64` / nn.LayerNorm(hidden_dim)
D_FF = 128           # position-wise FF inner width (== 2 * HIDDEN_DIM)
EPS = 1e-5           # nn.LayerNorm default eps


def _encoder_block_kernel(
    x_ref,                       # (2*B*S, D)  concat([trg, src]) flattened
    ln_gb_ref,                   # (2, D)      [gamma; beta]
    w_sq_ref,                    # (4, D, D)   [wq, wo, r0w, r1w]
    w_wide_ref,                  # (2, D, 2D)  [wk|wv, w1]
    w2_ref,                      # (2D, D)
    b64_ref,                     # (5, D)      [bq, bo, r0b, b2, r1b]
    b128_ref,                    # (2, 2D)     [bk|bv, b1]
    out_ref,                     # (B*S, D)
    *, B, S,
):
    D = HIDDEN_DIM
    n = B * S

    gamma = ln_gb_ref[0:1, :]    # (1, D)
    beta = ln_gb_ref[1:2, :]     # (1, D)

    def layer_norm(x):
        mu = jnp.mean(x, axis=-1, keepdims=True)
        msq = jnp.mean(x * x, axis=-1, keepdims=True)
        inv = jax.lax.rsqrt(msq - mu * mu + EPS)
        return (x - mu) * inv * gamma + beta

    # ---- out = layer_norm(trg); src = layer_norm(src)  (single fused pass) ----
    x_ln = layer_norm(x_ref[...])           # (2n, D)
    q_in = x_ln[:n, :]                      # LayerNorm(trg)
    kv_in = x_ln[n:, :]                     # LayerNorm(src)

    # ---- self_attention(query=out, key=src, value=src, mask=None) ----
    q = (jnp.dot(q_in, w_sq_ref[0], preferred_element_type=jnp.float32)
         + b64_ref[0:1, :])                                              # (n, D)
    kv = (jnp.dot(kv_in, w_wide_ref[0], preferred_element_type=jnp.float32)
          + b128_ref[0:1, :])                                            # (n, 2D)
    k = kv[:, :D]
    v = kv[:, D:]

    scale = 1.0 / math.sqrt(D)
    attn_rows = []
    for b in range(B):                      # short unrolled per-batch loop
        lo = b * S
        q_b = q[lo:lo + S, :]
        k_b = k[lo:lo + S, :]
        v_b = v[lo:lo + S, :]
        s = jax.lax.dot_general(            # contract last dims; no explicit k.T
            q_b, k_b,
            dimension_numbers=(((1,), (1,)), ((), ())),
            preferred_element_type=jnp.float32) * scale                  # (S, S)
        m = jnp.max(s, axis=-1, keepdims=True)
        p = jnp.exp(s - m)
        p = p * pl.reciprocal(jnp.sum(p, axis=-1, keepdims=True), approx=True)
        attn_rows.append(jnp.dot(p, v_b, preferred_element_type=jnp.float32))
    attn = jnp.concatenate(attn_rows, axis=0) if B > 1 else attn_rows[0]  # (n, D)

    attn = (jnp.dot(attn, w_sq_ref[1], preferred_element_type=jnp.float32)
            + b64_ref[1:2, :])                                           # (n, D)

    # ---- out = residuals[0](layer_norm(dropout(out))) ----
    y = layer_norm(attn)
    out = (jnp.dot(y, w_sq_ref[2], preferred_element_type=jnp.float32)
           + b64_ref[2:3, :] + y)

    # ---- out = position_ff(layer_norm(dropout(out))) ----
    z = layer_norm(out)
    h = jnp.maximum(
        jnp.dot(z, w_wide_ref[1], preferred_element_type=jnp.float32)
        + b128_ref[1:2, :], 0.0)                                         # (n, D_FF)
    out = (jnp.dot(h, w2_ref[...], preferred_element_type=jnp.float32)
           + b64_ref[3:4, :])

    # ---- out = residuals[1](layer_norm(dropout(out))) ----
    w = layer_norm(out)
    out = (jnp.dot(w, w_sq_ref[3], preferred_element_type=jnp.float32)
           + b64_ref[4:5, :] + w)

    # ---- out = dropout(out)  (identity, eval mode) ----
    out_ref[...] = out.astype(out_ref.dtype)


def encoder_block(trg, src, packed):
    """trg, src: (B, S, D) float32. packed: list of 6 packed weight arrays."""
    B, S, D = trg.shape
    assert D == HIDDEN_DIM

    # All layout plumbing in the wrapper: one lane-friendly (2*B*S, D) slab in,
    # one (B*S, D) slab out.
    x_cat = jnp.concatenate([trg, src], axis=0).reshape(2 * B * S, D)

    kernel = functools.partial(_encoder_block_kernel, B=B, S=S)

    def full_spec(arr):
        nd = arr.ndim
        return pl.BlockSpec(arr.shape, lambda i, _nd=nd: (0,) * _nd)

    in_specs = [full_spec(x_cat)] + [full_spec(p) for p in packed]

    out_flat = pl.pallas_call(
        kernel,
        out_shape=jax.ShapeDtypeStruct((B * S, D), jnp.float32),
        grid_spec=pltpu.PrefetchScalarGridSpec(
            num_scalar_prefetch=0,
            grid=(1,),                       # single grid step: whole problem in VMEM
            in_specs=in_specs,
            out_specs=pl.BlockSpec((B * S, D), lambda i: (0, 0)),
        ),
        compiler_params=pltpu.CompilerParams(
            dimension_semantics=("arbitrary",),
        ),
    )(x_cat, *packed)
    return out_flat.reshape(B, S, D)


def init_params(key):
    """Deterministic synthetic parameters (raw, unpacked)."""
    ks = jax.random.split(key, 8)

    def lin(k, din, dout):
        w = jax.random.normal(k, (din, dout), jnp.float32) * (1.0 / math.sqrt(din))
        b = jnp.full((dout,), 0.01, jnp.float32)
        return w, b

    p = {}
    p["ln_g"] = jnp.ones((HIDDEN_DIM,), jnp.float32)
    p["ln_b"] = jnp.zeros((HIDDEN_DIM,), jnp.float32)
    p["wq"], p["bq"] = lin(ks[0], HIDDEN_DIM, HIDDEN_DIM)
    p["wk"], p["bk"] = lin(ks[1], HIDDEN_DIM, HIDDEN_DIM)
    p["wv"], p["bv"] = lin(ks[2], HIDDEN_DIM, HIDDEN_DIM)
    p["wo"], p["bo"] = lin(ks[3], HIDDEN_DIM, HIDDEN_DIM)
    p["r0w"], p["r0b"] = lin(ks[4], HIDDEN_DIM, HIDDEN_DIM)
    p["w1"], p["b1"] = lin(ks[5], HIDDEN_DIM, D_FF)
    p["w2"], p["b2"] = lin(ks[6], D_FF, HIDDEN_DIM)
    p["r1w"], p["r1b"] = lin(ks[7], HIDDEN_DIM, HIDDEN_DIM)
    return p


def pack_params(p):
    """Pack 18 small tensors into 6 DMA-friendly slabs."""
    assert p["w1"].shape == (HIDDEN_DIM, D_FF) and D_FF == 2 * HIDDEN_DIM
    ln_gb = jnp.stack([p["ln_g"], p["ln_b"]], axis=0)                      # (2, D)
    w_sq = jnp.stack([p["wq"], p["wo"], p["r0w"], p["r1w"]], axis=0)       # (4, D, D)
    w_kv = jnp.concatenate([p["wk"], p["wv"]], axis=1)                     # (D, 2D)
    w_wide = jnp.stack([w_kv, p["w1"]], axis=0)                            # (2, D, 2D)
    w2 = p["w2"]                                                           # (2D, D)
    b64 = jnp.stack([p["bq"], p["bo"], p["r0b"], p["b2"], p["r1b"]], 0)    # (5, D)
    b128 = jnp.stack(
        [jnp.concatenate([p["bk"], p["bv"]]), p["b1"]], axis=0)            # (2, 2D)
    return [ln_gb, w_sq, w_wide, w2, b64, b128]


def reference(trg, src, p):
    """Pure-JAX reference of the same forward, for a correctness check."""
    def ln(x):
        mu = jnp.mean(x, axis=-1, keepdims=True)
        var = jnp.mean((x - mu) ** 2, axis=-1, keepdims=True)
        return (x - mu) / jnp.sqrt(var + EPS) * p["ln_g"] + p["ln_b"]

    q_in, kv_in = ln(trg), ln(src)
    q = q_in @ p["wq"] + p["bq"]
    k = kv_in @ p["wk"] + p["bk"]
    v = kv_in @ p["wv"] + p["bv"]
    s = jnp.einsum("bqd,bkd->bqk", q, k) / math.sqrt(HIDDEN_DIM)
    pr = jax.nn.softmax(s, axis=-1)
    attn = jnp.einsum("bqk,bkd->bqd", pr, v) @ p["wo"] + p["bo"]
    y = ln(attn)
    out = y @ p["r0w"] + p["r0b"] + y
    z = ln(out)
    out = jnp.maximum(z @ p["w1"] + p["b1"], 0.0) @ p["w2"] + p["b2"]
    w = ln(out)
    out = w @ p["r1w"] + p["r1b"] + w
    return out


if __name__ == "__main__":
    key = jax.random.PRNGKey(0)
    k_trg, k_src, k_p = jax.random.split(key, 3)

    B, S, D = 2, 8, HIDDEN_DIM
    trg = jax.random.normal(k_trg, (B, S, D), jnp.float32)
    src = jax.random.normal(k_src, (B, S, D), jnp.float32)
    raw = init_params(k_p)
    packed = pack_params(raw)

    out = encoder_block(trg, src, packed)
    out = jax.block_until_ready(out)

    ref = reference(trg, src, raw)
    assert out.shape == (B, S, D)
    # Tolerance slightly relaxed vs the exact-f32 path to cover the approx
    # (EUP) reciprocal used in the softmax denominator.
    err = float(jnp.max(jnp.abs(out - ref)))
    assert jnp.allclose(out, ref, rtol=2e-3, atol=2e-3), err
    print("KERNEL_OK")
</pallas_src>

<mosaic_0001>
module attributes {stable_mosaic.version = 11 : i64} {
  func.func @_encoder_block_kernel(%arg0: i32, %arg1: memref<32x64xf32, #tpu.memory_space<vmem>>, %arg2: memref<2x64xf32, #tpu.memory_space<vmem>>, %arg3: memref<4x64x64xf32, #tpu.memory_space<vmem>>, %arg4: memref<2x64x128xf32, #tpu.memory_space<vmem>>, %arg5: memref<128x64xf32, #tpu.memory_space<vmem>>, %arg6: memref<5x64xf32, #tpu.memory_space<vmem>>, %arg7: memref<2x128xf32, #tpu.memory_space<vmem>>, %arg8: memref<16x64xf32, #tpu.memory_space<vmem>>) attributes {dimension_semantics = [#tpu.dimension_semantics<arbitrary>], iteration_bounds = array<i64: 1>, scalar_prefetch = 0 : i64, scratch_operands = 0 : i64, tpu.core_type = #tpu.core_type<tc>, window_params = [{pipeline_mode = #tpu.pipeline_mode<synchronous>, transform_indices = @transform_0, window_bounds = array<i64: 32, 64>}, {pipeline_mode = #tpu.pipeline_mode<synchronous>, transform_indices = @transform_1, window_bounds = array<i64: 2, 64>}, {pipeline_mode = #tpu.pipeline_mode<synchronous>, transform_indices = @transform_2, window_bounds = array<i64: 4, 64, 64>}, {pipeline_mode = #tpu.pipeline_mode<synchronous>, transform_indices = @transform_3, window_bounds = array<i64: 2, 64, 128>}, {pipeline_mode = #tpu.pipeline_mode<synchronous>, transform_indices = @transform_4, window_bounds = array<i64: 128, 64>}, {pipeline_mode = #tpu.pipeline_mode<synchronous>, transform_indices = @transform_5, window_bounds = array<i64: 5, 64>}, {pipeline_mode = #tpu.pipeline_mode<synchronous>, transform_indices = @transform_6, window_bounds = array<i64: 2, 128>}, {pipeline_mode = #tpu.pipeline_mode<synchronous>, transform_indices = @transform_7, window_bounds = array<i64: 16, 64>}]} {
    %c0 = arith.constant 0 : index
    %c0_0 = arith.constant 0 : index
    %0 = vector.load %arg2[%c0, %c0_0] : memref<2x64xf32, #tpu.memory_space<vmem>>, vector<1x64xf32>
    %c1 = arith.constant 1 : index
    %c0_1 = arith.constant 0 : index
    %1 = vector.load %arg2[%c1, %c0_1] : memref<2x64xf32, #tpu.memory_space<vmem>>, vector<1x64xf32>
    %c0_2 = arith.constant 0 : index
    %c0_3 = arith.constant 0 : index
    %2 = vector.load %arg1[%c0_2, %c0_3] : memref<32x64xf32, #tpu.memory_space<vmem>>, vector<32x64xf32>
    %cst = arith.constant dense<0.000000e+00> : vector<32xf32>
    %3 = vector.multi_reduction <add>, %2, %cst [1] : vector<32x64xf32> to vector<32xf32>
    %4 = vector.shape_cast %3 : vector<32xf32> to vector<32x1xf32>
    %cst_4 = arith.constant 6.400000e+01 : f32
    %5 = vector.broadcast %cst_4 : f32 to vector<32x1xf32>
    %6 = arith.divf %4, %5 : vector<32x1xf32>
    %7 = arith.mulf %2, %2 : vector<32x64xf32>
    %cst_5 = arith.constant dense<0.000000e+00> : vector<32xf32>
    %8 = vector.multi_reduction <add>, %7, %cst_5 [1] : vector<32x64xf32> to vector<32xf32>
    %9 = vector.shape_cast %8 : vector<32xf32> to vector<32x1xf32>
    %cst_6 = arith.constant 6.400000e+01 : f32
    %10 = vector.broadcast %cst_6 : f32 to vector<32x1xf32>
    %11 = arith.divf %9, %10 : vector<32x1xf32>
    %12 = arith.mulf %6, %6 : vector<32x1xf32>
    %13 = arith.subf %11, %12 : vector<32x1xf32>
    %cst_7 = arith.constant 9.99999974E-6 : f32
    %14 = vector.broadcast %cst_7 : f32 to vector<32x1xf32>
    %15 = arith.addf %13, %14 : vector<32x1xf32>
    %16 = math.rsqrt %15 : vector<32x1xf32>
    %17 = vector.broadcast %6 : vector<32x1xf32> to vector<32x64xf32>
    %18 = arith.subf %2, %17 : vector<32x64xf32>
    %19 = vector.broadcast %16 : vector<32x1xf32> to vector<32x64xf32>
    %20 = arith.mulf %18, %19 : vector<32x64xf32>
    %21 = vector.broadcast %0 : vector<1x64xf32> to vector<32x64xf32>
    %22 = arith.mulf %20, %21 : vector<32x64xf32>
    %23 = vector.broadcast %1 : vector<1x64xf32> to vector<32x64xf32>
    %24 = arith.addf %22, %23 : vector<32x64xf32>
    %25 = vector.extract_strided_slice %24 {offsets = [0, 0], sizes = [16, 64], strides = [1, 1]} : vector<32x64xf32> to vector<16x64xf32>
    %26 = vector.extract_strided_slice %24 {offsets = [16, 0], sizes = [16, 64], strides = [1, 1]} : vector<32x64xf32> to vector<16x64xf32>
    %c0_8 = arith.constant 0 : index
    %c0_9 = arith.constant 0 : index
    %c0_10 = arith.constant 0 : index
    %27 = vector.load %arg3[%c0_8, %c0_9, %c0_10] : memref<4x64x64xf32, #tpu.memory_space<vmem>>, vector<1x64x64xf32>
    %28 = vector.shape_cast %27 : vector<1x64x64xf32> to vector<64x64xf32>
    %cst_11 = arith.constant dense<0.000000e+00> : vector<16x64xf32>
    %29 = tpu.matmul %25, %28, %cst_11 {dimension_numbers = #tpu.dot_dimension_numbers<[1], [0], [0], [1], [0, 0, 1, 1], [], []>} : vector<16x64xf32>, vector<64x64xf32>, vector<16x64xf32> -> vector<16x64xf32>
    %c0_12 = arith.constant 0 : index
    %c0_13 = arith.constant 0 : index
    %30 = vector.load %arg6[%c0_12, %c0_13] : memref<5x64xf32, #tpu.memory_space<vmem>>, vector<1x64xf32>
    %31 = vector.broadcast %30 : vector<1x64xf32> to vector<16x64xf32>
    %32 = arith.addf %29, %31 : vector<16x64xf32>
    %c0_14 = arith.constant 0 : index
    %c0_15 = arith.constant 0 : index
    %c0_16 = arith.constant 0 : index
    %33 = vector.load %arg4[%c0_14, %c0_15, %c0_16] : memref<2x64x128xf32, #tpu.memory_space<vmem>>, vector<1x64x128xf32>
    %34 = vector.shape_cast %33 : vector<1x64x128xf32> to vector<64x128xf32>
    %cst_17 = arith.constant dense<0.000000e+00> : vector<16x128xf32>
    %35 = tpu.matmul %26, %34, %cst_17 {dimension_numbers = #tpu.dot_dimension_numbers<[1], [0], [0], [1], [0, 0, 1, 1], [], []>} : vector<16x64xf32>, vector<64x128xf32>, vector<16x128xf32> -> vector<16x128xf32>
    %c0_18 = arith.constant 0 : index
    %c0_19 = arith.constant 0 : index
    %36 = vector.load %arg7[%c0_18, %c0_19] : memref<2x128xf32, #tpu.memory_space<vmem>>, vector<1x128xf32>
    %37 = vector.broadcast %36 : vector<1x128xf32> to vector<16x128xf32>
    %38 = arith.addf %35, %37 : vector<16x128xf32>
    %39 = vector.extract_strided_slice %38 {offsets = [0, 0], sizes = [16, 64], strides = [1, 1]} : vector<16x128xf32> to vector<16x64xf32>
    %40 = vector.extract_strided_slice %38 {offsets = [0, 64], sizes = [16, 64], strides = [1, 1]} : vector<16x128xf32> to vector<16x64xf32>
    %41 = vector.extract_strided_slice %32 {offsets = [0, 0], sizes = [8, 64], strides = [1, 1]} : vector<16x64xf32> to vector<8x64xf32>
    %42 = vector.extract_strided_slice %39 {offsets = [0, 0], sizes = [8, 64], strides = [1, 1]} : vector<16x64xf32> to vector<8x64xf32>
    %43 = vector.extract_strided_slice %40 {offsets = [0, 0], sizes = [8, 64], strides = [1, 1]} : vector<16x64xf32> to vector<8x64xf32>
    %cst_20 = arith.constant dense<0.000000e+00> : vector<8x8xf32>
    %44 = tpu.matmul %41, %42, %cst_20 {dimension_numbers = #tpu.dot_dimension_numbers<[1], [1], [0], [0], [0, 0, 1, 0], [], []>} : vector<8x64xf32>, vector<8x64xf32>, vector<8x8xf32> -> vector<8x8xf32>
    %cst_21 = arith.constant 1.250000e-01 : f32
    %45 = vector.broadcast %cst_21 : f32 to vector<8x8xf32>
    %46 = arith.mulf %44, %45 : vector<8x8xf32>
    %cst_22 = arith.constant dense<0xFF800000> : vector<8xf32>
    %47 = vector.multi_reduction <maximumf>, %46, %cst_22 [1] : vector<8x8xf32> to vector<8xf32>
    %48 = vector.shape_cast %47 : vector<8xf32> to vector<8x1xf32>
    %49 = vector.broadcast %48 : vector<8x1xf32> to vector<8x8xf32>
    %50 = arith.subf %46, %49 : vector<8x8xf32>
    %51 = math.exp %50 : vector<8x8xf32>
    %cst_23 = arith.constant dense<0.000000e+00> : vector<8xf32>
    %52 = vector.multi_reduction <add>, %51, %cst_23 [1] : vector<8x8xf32> to vector<8xf32>
    %53 = vector.shape_cast %52 : vector<8xf32> to vector<8x1xf32>
    %54 = tpu.reciprocal %53 {approx = true} : vector<8x1xf32> -> vector<8x1xf32>
    %55 = vector.broadcast %54 : vector<8x1xf32> to vector<8x8xf32>
    %56 = arith.mulf %51, %55 : vector<8x8xf32>
    %cst_24 = arith.constant dense<0.000000e+00> : vector<8x64xf32>
    %57 = tpu.matmul %56, %43, %cst_24 {dimension_numbers = #tpu.dot_dimension_numbers<[1], [0], [0], [1], [0, 0, 1, 1], [], []>} : vector<8x8xf32>, vector<8x64xf32>, vector<8x64xf32> -> vector<8x64xf32>
    %58 = vector.extract_strided_slice %32 {offsets = [8, 0], sizes = [8, 64], strides = [1, 1]} : vector<16x64xf32> to vector<8x64xf32>
    %59 = vector.extract_strided_slice %39 {offsets = [8, 0], sizes = [8, 64], strides = [1, 1]} : vector<16x64xf32> to vector<8x64xf32>
    %60 = vector.extract_strided_slice %40 {offsets = [8, 0], sizes = [8, 64], strides = [1, 1]} : vector<16x64xf32> to vector<8x64xf32>
    %cst_25 = arith.constant dense<0.000000e+00> : vector<8x8xf32>
    %61 = tpu.matmul %58, %59, %cst_25 {dimension_numbers = #tpu.dot_dimension_numbers<[1], [1], [0], [0], [0, 0, 1, 0], [], []>} : vector<8x64xf32>, vector<8x64xf32>, vector<8x8xf32> -> vector<8x8xf32>
    %cst_26 = arith.constant 1.250000e-01 : f32
    %62 = vector.broadcast %cst_26 : f32 to vector<8x8xf32>
    %63 = arith.mulf %61, %62 : vector<8x8xf32>
    %cst_27 = arith.constant dense<0xFF800000> : vector<8xf32>
    %64 = vector.multi_reduction <maximumf>, %63, %cst_27 [1] : vector<8x8xf32> to vector<8xf32>
    %65 = vector.shape_cast %64 : vector<8xf32> to vector<8x1xf32>
    %66 = vector.broadcast %65 : vector<8x1xf32> to vector<8x8xf32>
    %67 = arith.subf %63, %66 : vector<8x8xf32>
    %68 = math.exp %67 : vector<8x8xf32>
    %cst_28 = arith.constant dense<0.000000e+00> : vector<8xf32>
    %69 = vector.multi_reduction <add>, %68, %cst_28 [1] : vector<8x8xf32> to vector<8xf32>
    %70 = vector.shape_cast %69 : vector<8xf32> to vector<8x1xf32>
    %71 = tpu.reciprocal %70 {approx = true} : vector<8x1xf32> -> vector<8x1xf32>
    %72 = vector.broadcast %71 : vector<8x1xf32> to vector<8x8xf32>
    %73 = arith.mulf %68, %72 : vector<8x8xf32>
    %cst_29 = arith.constant dense<0.000000e+00> : vector<8x64xf32>
    %74 = tpu.matmul %73, %60, %cst_29 {dimension_numbers = #tpu.dot_dimension_numbers<[1], [0], [0], [1], [0, 0, 1, 1], [], []>} : vector<8x8xf32>, vector<8x64xf32>, vector<8x64xf32> -> vector<8x64xf32>
    %75 = tpu.concatenate %57, %74 in 0 : vector<8x64xf32>, vector<8x64xf32> -> vector<16x64xf32>
    %c1_30 = arith.constant 1 : index
    %c0_31 = arith.constant 0 : index
    %c0_32 = arith.constant 0 : index
    %76 = vector.load %arg3[%c1_30, %c0_31, %c0_32] : memref<4x64x64xf32, #tpu.memory_space<vmem>>, vector<1x64x64xf32>
    %77 = vector.shape_cast %76 : vector<1x64x64xf32> to vector<64x64xf32>
    %cst_33 = arith.constant dense<0.000000e+00> : vector<16x64xf32>
    %78 = tpu.matmul %75, %77, %cst_33 {dimension_numbers = #tpu.dot_dimension_numbers<[1], [0], [0], [1], [0, 0, 1, 1], [], []>} : vector<16x64xf32>, vector<64x64xf32>, vector<16x64xf32> -> vector<16x64xf32>
    %c1_34 = arith.constant 1 : index
    %c0_35 = arith.constant 0 : index
    %79 = vector.load %arg6[%c1_34, %c0_35] : memref<5x64xf32, #tpu.memory_space<vmem>>, vector<1x64xf32>
    %80 = vector.broadcast %79 : vector<1x64xf32> to vector<16x64xf32>
    %81 = arith.addf %78, %80 : vector<16x64xf32>
    %cst_36 = arith.constant dense<0.000000e+00> : vector<16xf32>
    %82 = vector.multi_reduction <add>, %81, %cst_36 [1] : vector<16x64xf32> to vector<16xf32>
    %83 = vector.shape_cast %82 : vector<16xf32> to vector<16x1xf32>
    %cst_37 = arith.constant 6.400000e+01 : f32
    %84 = vector.broadcast %cst_37 : f32 to vector<16x1xf32>
    %85 = arith.divf %83, %84 : vector<16x1xf32>
    %86 = arith.mulf %81, %81 : vector<16x64xf32>
    %cst_38 = arith.constant dense<0.000000e+00> : vector<16xf32>
    %87 = vector.multi_reduction <add>, %86, %cst_38 [1] : vector<16x64xf32> to vector<16xf32>
    %88 = vector.shape_cast %87 : vector<16xf32> to vector<16x1xf32>
    %cst_39 = arith.constant 6.400000e+01 : f32
    %89 = vector.broadcast %cst_39 : f32 to vector<16x1xf32>
    %90 = arith.divf %88, %89 : vector<16x1xf32>
    %91 = arith.mulf %85, %85 : vector<16x1xf32>
    %92 = arith.subf %90, %91 : vector<16x1xf32>
    %cst_40 = arith.constant 9.99999974E-6 : f32
    %93 = vector.broadcast %cst_40 : f32 to vector<16x1xf32>
    %94 = arith.addf %92, %93 : vector<16x1xf32>
    %95 = math.rsqrt %94 : vector<16x1xf32>
    %96 = vector.broadcast %85 : vector<16x1xf32> to vector<16x64xf32>
    %97 = arith.subf %81, %96 : vector<16x64xf32>
    %98 = vector.broadcast %95 : vector<16x1xf32> to vector<16x64xf32>
    %99 = arith.mulf %97, %98 : vector<16x64xf32>
    %100 = vector.broadcast %0 : vector<1x64xf32> to vector<16x64xf32>
    %101 = arith.mulf %99, %100 : vector<16x64xf32>
    %102 = vector.broadcast %1 : vector<1x64xf32> to vector<16x64xf32>
    %103 = arith.addf %101, %102 : vector<16x64xf32>
    %c2 = arith.constant 2 : index
    %c0_41 = arith.constant 0 : index
    %c0_42 = arith.constant 0 : index
    %104 = vector.load %arg3[%c2, %c0_41, %c0_42] : memref<4x64x64xf32, #tpu.memory_space<vmem>>, vector<1x64x64xf32>
    %105 = vector.shape_cast %104 : vector<1x64x64xf32> to vector<64x64xf32>
    %cst_43 = arith.constant dense<0.000000e+00> : vector<16x64xf32>
    %106 = tpu.matmul %103, %105, %cst_43 {dimension_numbers = #tpu.dot_dimension_numbers<[1], [0], [0], [1], [0, 0, 1, 1], [], []>} : vector<16x64xf32>, vector<64x64xf32>, vector<16x64xf32> -> vector<16x64xf32>
    %c2_44 = arith.constant 2 : index
    %c0_45 = arith.constant 0 : index
    %107 = vector.load %arg6[%c2_44, %c0_45] : memref<5x64xf32, #tpu.memory_space<vmem>>, vector<1x64xf32>
    %108 = vector.broadcast %107 : vector<1x64xf32> to vector<16x64xf32>
    %109 = arith.addf %106, %108 : vector<16x64xf32>
    %110 = arith.addf %109, %103 : vector<16x64xf32>
    %cst_46 = arith.constant dense<0.000000e+00> : vector<16xf32>
    %111 = vector.multi_reduction <add>, %110, %cst_46 [1] : vector<16x64xf32> to vector<16xf32>
    %112 = vector.shape_cast %111 : vector<16xf32> to vector<16x1xf32>
    %cst_47 = arith.constant 6.400000e+01 : f32
    %113 = vector.broadcast %cst_47 : f32 to vector<16x1xf32>
    %114 = arith.divf %112, %113 : vector<16x1xf32>
    %115 = arith.mulf %110, %110 : vector<16x64xf32>
    %cst_48 = arith.constant dense<0.000000e+00> : vector<16xf32>
    %116 = vector.multi_reduction <add>, %115, %cst_48 [1] : vector<16x64xf32> to vector<16xf32>
    %117 = vector.shape_cast %116 : vector<16xf32> to vector<16x1xf32>
    %cst_49 = arith.constant 6.400000e+01 : f32
    %118 = vector.broadcast %cst_49 : f32 to vector<16x1xf32>
    %119 = arith.divf %117, %118 : vector<16x1xf32>
    %120 = arith.mulf %114, %114 : vector<16x1xf32>
    %121 = arith.subf %119, %120 : vector<16x1xf32>
    %cst_50 = arith.constant 9.99999974E-6 : f32
    %122 = vector.broadcast %cst_50 : f32 to vector<16x1xf32>
    %123 = arith.addf %121, %122 : vector<16x1xf32>
    %124 = math.rsqrt %123 : vector<16x1xf32>
    %125 = vector.broadcast %114 : vector<16x1xf32> to vector<16x64xf32>
    %126 = arith.subf %110, %125 : vector<16x64xf32>
    %127 = vector.broadcast %124 : vector<16x1xf32> to vector<16x64xf32>
    %128 = arith.mulf %126, %127 : vector<16x64xf32>
    %129 = vector.broadcast %0 : vector<1x64xf32> to vector<16x64xf32>
    %130 = arith.mulf %128, %129 : vector<16x64xf32>
    %131 = vector.broadcast %1 : vector<1x64xf32> to vector<16x64xf32>
    %132 = arith.addf %130, %131 : vector<16x64xf32>
    %c1_51 = arith.constant 1 : index
    %c0_52 = arith.constant 0 : index
    %c0_53 = arith.constant 0 : index
    %133 = vector.load %arg4[%c1_51, %c0_52, %c0_53] : memref<2x64x128xf32, #tpu.memory_space<vmem>>, vector<1x64x128xf32>
    %134 = vector.shape_cast %133 : vector<1x64x128xf32> to vector<64x128xf32>
    %cst_54 = arith.constant dense<0.000000e+00> : vector<16x128xf32>
    %135 = tpu.matmul %132, %134, %cst_54 {dimension_numbers = #tpu.dot_dimension_numbers<[1], [0], [0], [1], [0, 0, 1, 1], [], []>} : vector<16x64xf32>, vector<64x128xf32>, vector<16x128xf32> -> vector<16x128xf32>
    %c1_55 = arith.constant 1 : index
    %c0_56 = arith.constant 0 : index
    %136 = vector.load %arg7[%c1_55, %c0_56] : memref<2x128xf32, #tpu.memory_space<vmem>>, vector<1x128xf32>
    %137 = vector.broadcast %136 : vector<1x128xf32> to vector<16x128xf32>
    %138 = arith.addf %135, %137 : vector<16x128xf32>
    %cst_57 = arith.constant 0.000000e+00 : f32
    %139 = vector.broadcast %cst_57 : f32 to vector<16x128xf32>
    %140 = arith.maximumf %138, %139 : vector<16x128xf32>
    %c0_58 = arith.constant 0 : index
    %c0_59 = arith.constant 0 : index
    %141 = vector.load %arg5[%c0_58, %c0_59] : memref<128x64xf32, #tpu.memory_space<vmem>>, vector<128x64xf32>
    %cst_60 = arith.constant dense<0.000000e+00> : vector<16x64xf32>
    %142 = tpu.matmul %140, %141, %cst_60 {dimension_numbers = #tpu.dot_dimension_numbers<[1], [0], [0], [1], [0, 0, 1, 1], [], []>} : vector<16x128xf32>, vector<128x64xf32>, vector<16x64xf32> -> vector<16x64xf32>
    %c3 = arith.constant 3 : index
    %c0_61 = arith.constant 0 : index
    %143 = vector.load %arg6[%c3, %c0_61] : memref<5x64xf32, #tpu.memory_space<vmem>>, vector<1x64xf32>
    %144 = vector.broadcast %143 : vector<1x64xf32> to vector<16x64xf32>
    %145 = arith.addf %142, %144 : vector<16x64xf32>
    %cst_62 = arith.constant dense<0.000000e+00> : vector<16xf32>
    %146 = vector.multi_reduction <add>, %145, %cst_62 [1] : vector<16x64xf32> to vector<16xf32>
    %147 = vector.shape_cast %146 : vector<16xf32> to vector<16x1xf32>
    %cst_63 = arith.constant 6.400000e+01 : f32
    %148 = vector.broadcast %cst_63 : f32 to vector<16x1xf32>
    %149 = arith.divf %147, %148 : vector<16x1xf32>
    %150 = arith.mulf %145, %145 : vector<16x64xf32>
    %cst_64 = arith.constant dense<0.000000e+00> : vector<16xf32>
    %151 = vector.multi_reduction <add>, %150, %cst_64 [1] : vector<16x64xf32> to vector<16xf32>
    %152 = vector.shape_cast %151 : vector<16xf32> to vector<16x1xf32>
    %cst_65 = arith.constant 6.400000e+01 : f32
    %153 = vector.broadcast %cst_65 : f32 to vector<16x1xf32>
    %154 = arith.divf %152, %153 : vector<16x1xf32>
    %155 = arith.mulf %149, %149 : vector<16x1xf32>
    %156 = arith.subf %154, %155 : vector<16x1xf32>
    %cst_66 = arith.constant 9.99999974E-6 : f32
    %157 = vector.broadcast %cst_66 : f32 to vector<16x1xf32>
    %158 = arith.addf %156, %157 : vector<16x1xf32>
    %159 = math.rsqrt %158 : vector<16x1xf32>
    %160 = vector.broadcast %149 : vector<16x1xf32> to vector<16x64xf32>
    %161 = arith.subf %145, %160 : vector<16x64xf32>
    %162 = vector.broadcast %159 : vector<16x1xf32> to vector<16x64xf32>
    %163 = arith.mulf %161, %162 : vector<16x64xf32>
    %164 = vector.broadcast %0 : vector<1x64xf32> to vector<16x64xf32>
    %165 = arith.mulf %163, %164 : vector<16x64xf32>
    %166 = vector.broadcast %1 : vector<1x64xf32> to vector<16x64xf32>
    %167 = arith.addf %165, %166 : vector<16x64xf32>
    %c3_67 = arith.constant 3 : index
    %c0_68 = arith.constant 0 : index
    %c0_69 = arith.constant 0 : index
    %168 = vector.load %arg3[%c3_67, %c0_68, %c0_69] : memref<4x64x64xf32, #tpu.memory_space<vmem>>, vector<1x64x64xf32>
    %169 = vector.shape_cast %168 : vector<1x64x64xf32> to vector<64x64xf32>
    %cst_70 = arith.constant dense<0.000000e+00> : vector<16x64xf32>
    %170 = tpu.matmul %167, %169, %cst_70 {dimension_numbers = #tpu.dot_dimension_numbers<[1], [0], [0], [1], [0, 0, 1, 1], [], []>} : vector<16x64xf32>, vector<64x64xf32>, vector<16x64xf32> -> vector<16x64xf32>
    %c4 = arith.constant 4 : index
    %c0_71 = arith.constant 0 : index
    %171 = vector.load %arg6[%c4, %c0_71] : memref<5x64xf32, #tpu.memory_space<vmem>>, vector<1x64xf32>
    %172 = vector.broadcast %171 : vector<1x64xf32> to vector<16x64xf32>
    %173 = arith.addf %170, %172 : vector<16x64xf32>
    %174 = arith.addf %173, %167 : vector<16x64xf32>
    %c0_72 = arith.constant 0 : index
    %c0_73 = arith.constant 0 : index
    %175 = vector.load %arg8[%c0_72, %c0_73] : memref<16x64xf32, #tpu.memory_space<vmem>>, vector<16x64xf32>
    tpu.vector_store %arg8[%c0_72, %c0_73], %174 {strides = array<i32>} : memref<16x64xf32, #tpu.memory_space<vmem>>, vector<16x64xf32>,
    return
  }
  func.func @transform_0(%arg0: i32) -> (i32, i32) {
    %c0_i32 = arith.constant 0 : i32
    %c0_i32_0 = arith.constant 0 : i32
    %c0_i32_1 = arith.constant 0 : i32
    return %c0_i32, %c0_i32_0 : i32, i32
  }
  func.func @transform_1(%arg0: i32) -> (i32, i32) {
    %c0_i32 = arith.constant 0 : i32
    %c0_i32_0 = arith.constant 0 : i32
    %c0_i32_1 = arith.constant 0 : i32
    return %c0_i32, %c0_i32_0 : i32, i32
  }
  func.func @transform_2(%arg0: i32) -> (i32, i32, i32) {
    %c0_i32 = arith.constant 0 : i32
    %c0_i32_0 = arith.constant 0 : i32
    %c0_i32_1 = arith.constant 0 : i32
    %c0_i32_2 = arith.constant 0 : i32
    return %c0_i32, %c0_i32_0, %c0_i32_1 : i32, i32, i32
  }
  func.func @transform_3(%arg0: i32) -> (i32, i32, i32) {
    %c0_i32 = arith.constant 0 : i32
    %c0_i32_0 = arith.constant 0 : i32
    %c0_i32_1 = arith.constant 0 : i32
    %c0_i32_2 = arith.constant 0 : i32
    return %c0_i32, %c0_i32_0, %c0_i32_1 : i32, i32, i32
  }
  func.func @transform_4(%arg0: i32) -> (i32, i32) {
    %c0_i32 = arith.constant 0 : i32
    %c0_i32_0 = arith.constant 0 : i32
    %c0_i32_1 = arith.constant 0 : i32
    return %c0_i32, %c0_i32_0 : i32, i32
  }
  func.func @transform_5(%arg0: i32) -> (i32, i32) {
    %c0_i32 = arith.constant 0 : i32
    %c0_i32_0 = arith.constant 0 : i32
    %c0_i32_1 = arith.constant 0 : i32
    return %c0_i32, %c0_i32_0 : i32, i32
  }
  func.func @transform_6(%arg0: i32) -> (i32, i32) {
    %c0_i32 = arith.constant 0 : i32
    %c0_i32_0 = arith.constant 0 : i32
    %c0_i32_1 = arith.constant 0 : i32
    return %c0_i32, %c0_i32_0 : i32, i32
  }
  func.func @transform_7(%arg0: i32) -> (i32, i32) {
    %c0_i32 = arith.constant 0 : i32
    %c0_i32_0 = arith.constant 0 : i32
    %c0_i32_1 = arith.constant 0 : i32
    return %c0_i32, %c0_i32_0 : i32, i32
  }
}

</mosaic_0001>

<bundles_post_ra>
// kernel: tpu_custom_call.1
= control target key start
LH: loop header
LB: loop body
LE: loop exit
PB: predicated region body
PF: predicated region fallthrough
CT: control target
= control target key end

     0   :  { %12 = vsyncpa [#allocation3], 0  ;;  %s1222_s0 = inlined_call_operand.vmem [shape: f32[32,64], index: 0, kind: input, shape index: {}]   ;;  %s1223_s1 = inlined_call_operand.vmem [shape: f32[2,64], index: 1, kind: input, shape index: {}]   ;;  %s1224_s2 = inlined_call_operand.hbm [shape: f32[4,64,64], index: 2, kind: input, shape index: {}]   ;;  %s1225_s3 = inlined_call_operand.vmem [shape: f32[2,64,128], index: 3, kind: input, shape index: {}]   ;;  %s1226_s4 = inlined_call_operand.vmem [shape: f32[128,64], index: 4, kind: input, shape index: {}]   ;;  %s1227_s5 = inlined_call_operand.vmem [shape: f32[5,64], index: 5, kind: input, shape index: {}]   ;;  %s1228_s6 = inlined_call_operand.vmem [shape: f32[2,128], index: 6, kind: input, shape index: {}]   ;;  %s1229_s7 = inlined_call_operand.hbm [shape: f32[16,64], index: 7, kind: output, shape index: {}]  }
   0x1   :  { %13 = vsyncpa [#allocation4], 0  ;;  %s22_s26 = sshll.u32 %s1224_s2, 4  ;;  %s877_s27 = smov [#allocation2]   ;;  %s23_s26 = int_to_ptr.hbm [resolvable:$true] %s22_s26 }
   0x2   :  { %s24_s28 = sshll.u32 %s877_s27, 4  ;;  %s878_s29 = smov 128   ;;  %s25_s28 = int_to_ptr.vmem [resolvable:$true] %s24_s28 }
   0x3   :  { %s879_s30 = smov 8  }
   0x4   :  { %30 = dma.hbm_to_vmem [thread:$0]  %s23_s26, 4096, %s25_s28, [#allocation3], %s878_s29, %s878_s29, %s879_s30  }
   0x5   :  { %873 = dma.done.wait [#allocation3], 4096  }
   0x6   :  { %874 = vsyncadd [#allocation3], 4294963200  ;;  %vm49_vm0 = vcmask 523264   ;;  %v932_v0 = vld [vmem:[%s1222_s0 + $0x10] sm:$0xff]  ;;  %v937_v1 = vld [vmem:[%s1222_s0] sm:$0xff]  ;;  %v880_v8 = vmov 64.0  }
   0x7   :  { %v56_v2 = vsel %vm49_vm0, %v932_v0, 0.0  ;;  %v50_v3 = vsel %vm49_vm0, %v937_v1, 0.0  ;;  %v75_v4 = vmul.f32 %v932_v0, %v932_v0  ;;  %v73_v5 = vmul.f32 %v937_v1, %v937_v1  ;;  %v170_v12 = vld [vmem:[#allocation2 + $0x38] sm:$0xff]  ;;  %v169_v15 = vld [vmem:[#allocation2 + $0x30] sm:$0xff]  ;;  %v168_v17 = vld [vmem:[#allocation2 + $0x28] sm:$0xff]  ;;  %s881_s15 = smov 64  }
   0x8   :  { %57 = vadd.xlane.f32.xlu0 %v56_v2  ;;  %51 = vadd.xlane.f32.xlu1 %v50_v3  ;;  %795 = vrcp.f32 %v880_v8  ;;  %v209_v13 = vld [vmem:[%s1225_s3 + $0x38] sm:$0xff]  ;;  %v208_v16 = vld [vmem:[%s1225_s3 + $0x30] sm:$0xff]  ;;  %v207_v18 = vld [vmem:[%s1225_s3 + $0x28] sm:$0xff]  ;;  %vm268_vm13 = vcmask 64512   ;;  %s741_s25 = sshll.u32 %s1229_s7, 4  ;;  %s742_s25 = int_to_ptr.hbm [resolvable:$true] %s741_s25 }
   0x9   :  { %v83_v6 = vsel %vm49_vm0, %v75_v4, 0.0  ;;  %v77_v7 = vsel %vm49_vm0, %v73_v5, 0.0  ;;  %187 = vmatpush.msra.mxu0 %v170_v12  ;;  %226 = vmatpush.msra.mxu1 %v209_v13  ;;  %v167_v20 = vld [vmem:[#allocation2 + $0x20] sm:$0xff]  ;;  %v166_v22 = vld [vmem:[#allocation2 + $0x18] sm:$0xff]  ;;  %v165_v26 = vld [vmem:[#allocation2 + $0x10] sm:$0xff] }
   0xa   :  { %v206_v21 = vld [vmem:[%s1225_s3 + $0x20] sm:$0xff]  ;;  %v205_v23 = vld [vmem:[%s1225_s3 + $0x18] sm:$0xff]  ;;  %v204_v28 = vld [vmem:[%s1225_s3 + $0x10] sm:$0xff] }
   0xb   :  { %188 = vmatpush.msra.mxu0 %v169_v15  ;;  %227 = vmatpush.msra.mxu1 %v208_v16  ;;  %v164_v29 = vld [vmem:[#allocation2 + $0x8] sm:$0xff]  ;;  %v163_v32 = vld [vmem:[#allocation2] sm:$0xff] }
   0xc   :  { %v203_v30 = vld [vmem:[%s1225_s3 + $0x8] sm:$0xff]  ;;  %v202_v34 = vld [vmem:[%s1225_s3] sm:$0xff] }
   0xd   :  { %189 = vmatpush.msra.mxu0 %v168_v17  ;;  %228 = vmatpush.msra.mxu1 %v207_v18  ;;  %v980_v38 = vld [vmem:[%s1222_s0 + $0x8] sm:$0xff]  ;;  %v991_v61 = vld [vmem:[%s1223_s1] ss:$0 sm:$0xff]  ;;  %v997_v3 = vld [vmem:[%s1223_s1 + $0x1] ss:$0 sm:$0xff] }
   0xe   :  { %v796_v9 = vpop.eup %795  ;;  %v74_v42 = vmul.f32 %v980_v38, %v980_v38  ;;  %v1020_v13 = vld [vmem:[%s1228_s6] ss:$0 sm:$0xff] }
   0xf   :  { %v63_v10 = vmul.f32 64.0, %v796_v9  ;;  %vm67_vm1 = vweird.f32 %v796_v9  ;;  %190 = vmatpush.msra.mxu0 %v167_v20  ;;  %229 = vmatpush.msra.mxu1 %v206_v21 }
  0x10   :  { %84 = vadd.xlane.f32.xlu0 %v83_v6  ;;  %78 = vadd.xlane.f32.xlu1 %v77_v7  ;;  %v80_v45 = vsel %vm49_vm0, %v74_v42, 0.0 }
  0x11   :  { %v64_v11 = vsub.f32 1.0, %v63_v10  ;;  %191 = vmatpush.msra.mxu0 %v166_v22  ;;  %230 = vmatpush.msra.mxu1 %v205_v23 }
  0x13   :  { %v65_v14 = vmul.f32 %v796_v9, %v64_v11  ;;  %192 = vmatpush.msra.mxu0 %v165_v26  ;;  %231 = vmatpush.msra.mxu1 %v204_v28 }
  0x15   :  { %v66_v19 = vadd.f32 %v796_v9, %v65_v14  ;;  %193 = vmatpush.msra.mxu0 %v164_v29  ;;  %232 = vmatpush.msra.mxu1 %v203_v30  ;;  %v1025_v14 = vld [vmem:[%s1227_s5] ss:$0 sm:$0xff] }
  0x17   :  { %v964_v27 = vsel %vm67_vm1, %v796_v9, %v66_v19  ;;  %194 = vmatpush.msra.mxu0 %v163_v32  ;;  %233 = vmatpush.msra.mxu1 %v202_v34  ;;  %v53_v9 = vsel %vm49_vm0, %v980_v38, 0.0 }
  0x18   :  { %81 = vadd.xlane.f32.xlu1 %v80_v45  ;;  %54 = vadd.xlane.f32.xlu0 %v53_v9  ;;  %v377_v9 = vld [vmem:[#allocation2 + $0x70] sm:$0xff] }
  0x7b   :  { %v58_v24 = vpop.xlane.xlu0 %57  ;;  %v52_v25 = vpop.xlane.xlu1 %51 }
  0x7c   :  { %v71_v31 = vmul.f32 %v964_v27, %v58_v24  ;;  %v69_v33 = vmul.f32 %v964_v27, %v52_v25 }
  0x7e   :  { %v95_v35 = vmul.f32 %v71_v31, %v71_v31  ;;  %v93_v39 = vmul.f32 %v69_v33, %v69_v33  ;;  %v147_v59 = vsub.f32 %v932_v0, %v71_v31  ;;  %v145_v62 = vsub.f32 %v937_v1, %v69_v33  ;;  %v1008_v1 = vld [vmem:[%s1222_s0 + $0x18] sm:$0xff] }
  0x7f   :  { %v59_v10 = vsel %vm49_vm0, %v1008_v1, 0.0  ;;  %v76_v11 = vmul.f32 %v1008_v1, %v1008_v1 }
  0x80   :  { %60 = vadd.xlane.f32.xlu2 %v59_v10  ;;  %v376_v10 = vld [vmem:[#allocation2 + $0x68] sm:$0xff] }
  0x81   :  { %v86_v12 = vsel %vm49_vm0, %v76_v11, 0.0 }
  0x83   :  { %v85_v36 = vpop.xlane.xlu0 %84  ;;  %v79_v37 = vpop.xlane.xlu1 %78 }
  0x84   :  { %v91_v40 = vmul.f32 %v85_v36, %v964_v27  ;;  %v89_v41 = vmul.f32 %v79_v37, %v964_v27 }
  0x86   :  { %v99_v43 = vsub.f32 %v91_v40, %v95_v35  ;;  %v97_v44 = vsub.f32 %v89_v41, %v93_v39 }
  0x88   :  { %v103_v46 = vadd.f32 1e-05, %v99_v43  ;;  %v101_v47 = vadd.f32 1e-05, %v97_v44  ;;  %87 = vadd.xlane.f32.xlu2 %v86_v12  ;;  %v375_v12 = vld [vmem:[#allocation2 + $0x60] sm:$0xff] }
  0x8a   :  { %797 = vrsqrt.f32 %v103_v46  ;;  %vm131_vm4 = vweird.f32 %v103_v46  ;;  %vm111_vm6 = vweird.f32 %v101_v47 }
  0x8b   :  { %799 = vrsqrt.f32 %v101_v47  ;;  %v82_v19 = vpop.xlane.xlu1 %81  ;;  %v55_v21 = vpop.xlane.xlu0 %54 }
  0x8c   :  { %v90_v22 = vmul.f32 %v82_v19, %v964_v27  ;;  %v70_v23 = vmul.f32 %v964_v27, %v55_v21 }
  0x8e   :  { %v94_v25 = vmul.f32 %v70_v23, %v70_v23  ;;  %v146_v43 = vsub.f32 %v980_v38, %v70_v23 }
  0x90   :  { %v798_v48 = vpop.eup %797  ;;  %v98_v26 = vsub.f32 %v90_v22, %v94_v25 }
  0x91   :  { %v800_v49 = vpop.eup %799  ;;  %v126_v50 = vmul.f32 %v798_v48, %v103_v46  ;;  %vm132_vm2 = vweird.f32 %v798_v48 }
  0x92   :  { %v106_v51 = vmul.f32 %v800_v49, %v101_v47  ;;  %vm112_vm3 = vweird.f32 %v800_v49  ;;  %vm133_vm5 = vmor %vm131_vm4, %vm132_vm2  ;;  %v102_v29 = vadd.f32 1e-05, %v98_v26 }
  0x93   :  { %v127_v52 = vmul.f32 %v798_v48, %v126_v50  ;;  %vm113_vm7 = vmor %vm111_vm6, %vm112_vm3 }
  0x94   :  { %v107_v53 = vmul.f32 %v800_v49, %v106_v51  ;;  %801 = vrsqrt.f32 %v102_v29  ;;  %vm121_vm8 = vweird.f32 %v102_v29 }
  0x95   :  { %v128_v54 = vmul.f32 0.5, %v127_v52 }
  0x96   :  { %v108_v55 = vmul.f32 0.5, %v107_v53 }
  0x97   :  { %v129_v56 = vsub.f32 1.5, %v128_v54 }
  0x98   :  { %v109_v57 = vsub.f32 1.5, %v108_v55 }
  0x99   :  { %v130_v58 = vmul.f32 %v798_v48, %v129_v56 }
  0x9a   :  { %v110_v60 = vmul.f32 %v800_v49, %v109_v57  ;;  %v802_v35 = vpop.eup %801 }
  0x9b   :  { %v134_v63 = vsel %vm133_vm5, %v798_v48, %v130_v58  ;;  %v116_v36 = vmul.f32 %v802_v35, %v102_v29  ;;  %vm122_vm9 = vweird.f32 %v802_v35 }
  0x9c   :  { %v114_v2 = vsel %vm113_vm7, %v800_v49, %v110_v60  ;;  %v151_v4 = vmul.f32 %v147_v59, %v134_v63  ;;  %vm123_vm10 = vmor %vm121_vm8, %vm122_vm9 }
  0x9d   :  { %v149_v0 = vmul.f32 %v145_v62, %v114_v2  ;;  %v117_v37 = vmul.f32 %v802_v35, %v116_v36  ;;  %v470_v36 = vld [vmem:[#allocation2 + $0xb8] sm:$0xff] }
  0x9e   :  { %v156_v5 = vmul.f32 %v991_v61, %v151_v4 }
  0x9f   :  { %v154_v6 = vmul.f32 %v991_v61, %v149_v0  ;;  %v118_v39 = vmul.f32 0.5, %v117_v37  ;;  %v469_v37 = vld [vmem:[#allocation2 + $0xb0] sm:$0xff] }
  0xa0   :  { %v161_v7 = vadd.f32 %v997_v3, %v156_v5 }
  0xa1   :  { %v159_v8 = vadd.f32 %v997_v3, %v154_v6  ;;  %v119_v42 = vsub.f32 1.5, %v118_v39  ;;  %v468_v39 = vld [vmem:[#allocation2 + $0xa8] sm:$0xff] }
  0xa2   :  { %756 = vmatmul.msk.f32.vlgmr.msra.gmra.mxu1 %vm49_vm0, %v161_v7 }
  0xa3   :  { %754 = vmatmul.msk.f32.vlgmr.msra.gmra.mxu0 %vm49_vm0, %v159_v8  ;;  %v120_v45 = vmul.f32 %v802_v35, %v119_v42 }
  0xa5   :  { %v124_v47 = vsel %vm123_vm10, %v802_v35, %v120_v45  ;;  %v465_v45 = vld [vmem:[#allocation2 + $0x90] sm:$0xff] }
  0xa6   :  { %v150_v48 = vmul.f32 %v146_v43, %v124_v47  ;;  %v463_v47 = vld [vmem:[#allocation2 + $0x80] sm:$0xff] }
  0xa8   :  { %v155_v53 = vmul.f32 %v991_v61, %v150_v48 }
  0xaa   :  { %v160_v38 = vadd.f32 %v997_v3, %v155_v53 }
  0xac   :  { %755 = vmatmul.msk.f32.gmra.mxu0 %vm49_vm0, %v160_v38 }
  0xf3   :  { %v61_v20 = vpop.xlane.xlu2 %60 }
  0xf4   :  { %v72_v24 = vmul.f32 %v964_v27, %v61_v20 }
  0xf6   :  { %v96_v28 = vmul.f32 %v72_v24, %v72_v24  ;;  %v148_v52 = vsub.f32 %v1008_v1, %v72_v24  ;;  %v378_v1 = vld [vmem:[#allocation2 + $0x78] sm:$0xff] }
  0xfb   :  { %v88_v31 = vpop.xlane.xlu2 %87 }
  0xfc   :  { %v92_v32 = vmul.f32 %v88_v31, %v964_v27 }
  0xfe   :  { %v100_v33 = vsub.f32 %v92_v32, %v96_v28  ;;  %v1057_v28 = vld [vmem:[%s1227_s5 + $0x1] ss:$0 sm:$0xff] }
 0x100   :  { %v104_v34 = vadd.f32 1e-05, %v100_v33 }
 0x102   :  { %803 = vrsqrt.f32 %v104_v34  ;;  %vm141_vm11 = vweird.f32 %v104_v34 }
 0x108   :  { %v804_v40 = vpop.eup %803 }
 0x109   :  { %v136_v41 = vmul.f32 %v804_v40, %v104_v34  ;;  %vm142_vm12 = vweird.f32 %v804_v40 }
 0x10a   :  { %vm143_vm14 = vmor %vm141_vm11, %vm142_vm12 }
 0x10b   :  { %v137_v44 = vmul.f32 %v804_v40, %v136_v41 }
 0x10d   :  { %v138_v46 = vmul.f32 0.5, %v137_v44  ;;  %v466_v44 = vld [vmem:[#allocation2 + $0x98] sm:$0xff] }
 0x10f   :  { %v139_v50 = vsub.f32 1.5, %v138_v46  ;;  %v464_v46 = vld [vmem:[#allocation2 + $0x88] sm:$0xff] }
 0x111   :  { %v140_v54 = vmul.f32 %v804_v40, %v139_v50 }
 0x113   :  { %v144_v56 = vsel %vm143_vm14, %v804_v40, %v140_v54  ;;  %v467_v40 = vld [vmem:[#allocation2 + $0xa0] sm:$0xff] }
 0x114   :  { %v152_v57 = vmul.f32 %v148_v52, %v144_v56 }
 0x116   :  { %v157_v58 = vmul.f32 %v991_v61, %v152_v57 }
 0x118   :  { %v162_v59 = vadd.f32 %v997_v3, %v157_v58 }
 0x11a   :  { %757 = vmatmul.msk.f32.gmra.mxu1 %vm49_vm0, %v162_v59 }
 0x11f   :  { %v235_v15 = vpop.f32.mrf.mxu1 }
 0x120   :  { %v196_v16 = vpop.f32.mrf.mxu0  ;;  %v236_v17 = vadd.f32 %v1020_v13, %v235_v15 }
 0x121   :  { %v197_v18 = vadd.f32 %v1025_v14, %v196_v16  ;;  %v374_v16 = vld [vmem:[#allocation2 + $0x58] sm:$0xff] }
 0x122   :  { %280 = vrot.lane.b32.xlu1 %v236_v17, %s881_s15  ;;  %758 = vmatpush.xpose.msk.msra.mxu2 %vm49_vm0, %v236_v17  ;;  %v372_v17 = vld [vmem:[#allocation2 + $0x48] sm:$0xff] }
 0x125   :  { %759 = vmatmul.msk.f32.vlgmr.msra.gmra.mxu2 %vm49_vm0, %v197_v18  ;;  %v371_v18 = vld [vmem:[#allocation2 + $0x40] sm:$0xff] }
 0x129   :  { %v199_v11 = vpop.f32.mrf.mxu0 }
 0x12a   :  { %v200_v15 = vadd.f32 %v1025_v14, %v199_v11 }
 0x194   :  { %v281_v30 = vpop.permute.xlu1 %280 }
 0x195   :  { %301 = vmatpush.msra.mxu3 %v281_v30 }
 0x197   :  { %v238_v0 = vpop.f32.mrf.mxu1 }
 0x198   :  { %v239_v5 = vadd.f32 %v1020_v13, %v238_v0  ;;  %v373_v13 = vld [vmem:[#allocation2 + $0x50] sm:$0xff]  ;;  %v1073_v0 = vld [vmem:[%s1227_s5 + $0x2] ss:$0 sm:$0xff] }
 0x19a   :  { %761 = vmatpush.xpose.msk.msrb.mxu3 %vm49_vm0, %v239_v5 }
 0x1a8   :  { %v264_v49 = vpop.f32.mrf.mxu2 }
 0x1a9   :  { %v267_v51 = vmul.f32 0.125, %v264_v49 }
 0x1ab   :  { %v269_v55 = vsel %vm268_vm13, %v267_v51, -inf }
 0x1ac   :  { %270 = vmax.xlane.f32.xlu2 %v269_v55 }
 0x21f   :  { %v271_v60 = vpop.xlane.xlu2 %270 }
 0x220   :  { %v272_v62 = vsub.f32 %v267_v51, %v271_v60 }
 0x222   :  { %v273_v63 = vmul.f32 1.442695, %v272_v62 }
 0x224   :  { %805 = vpow2.f32 %v273_v63 }
 0x22a   :  { %v806_v2 = vpop.eup %805 }
 0x22b   :  { %v275_v4 = vsel %vm268_vm13, %v806_v2, 0.0 }
 0x22c   :  { %276 = vadd.xlane.f32.xlu0 %v275_v4 }
 0x29f   :  { %v277_v6 = vpop.xlane.xlu0 %276 }
 0x2a0   :  { %807 = vrcp.f32 %v277_v6 }
 0x2a6   :  { %v808_v7 = vpop.eup %807 }
 0x2a7   :  { %v279_v8 = vmul.f32 %v808_v7, %v806_v2 }
 0x2a9   :  { %760 = vmatmul.msk.f32.vlgmr.msra.gmra.mxu3 %vm268_vm13, %v279_v8 }
 0x2aa   :  { %395 = vmatpush.msra.mxu3 %v378_v1 }
 0x2ac   :  { %396 = vmatpush.msra.mxu3 %v377_v9 }
 0x2ae   :  { %397 = vmatpush.msra.mxu3 %v376_v10 }
 0x2b0   :  { %398 = vmatpush.msra.mxu3 %v375_v12 }
 0x2b1   :  { %762 = vmatmul.msk.f32.vlgmr.msrb.gmra.mxu3 %vm49_vm0, %v200_v15 }
 0x2b2   :  { %399 = vmatpush.msra.mxu3 %v374_v16 }
 0x2b4   :  { %400 = vmatpush.msra.mxu3 %v373_v13  ;;  %v775_v13 = vld [vmem:[%s1225_s3 + $0x78] sm:$0xff] }
 0x2b5   :  { %581 = vmatpush.msrb.mxu0 %v775_v13  ;;  %v1178_v13 = vld [vmem:[%s1228_s6 + $0x1] ss:$0 sm:$0xff] }
 0x2b6   :  { %401 = vmatpush.msra.mxu3 %v372_v17  ;;  %v774_v17 = vld [vmem:[%s1225_s3 + $0x70] sm:$0xff] }
 0x2b7   :  { %582 = vmatpush.msrb.mxu0 %v774_v17 }
 0x2b8   :  { %402 = vmatpush.msra.mxu3 %v371_v18  ;;  %v773_v18 = vld [vmem:[%s1225_s3 + $0x68] sm:$0xff] }
 0x2b9   :  { %583 = vmatpush.msrb.mxu0 %v773_v18 }
 0x32c   :  { %v303_v19 = vpop.f32.mrf.mxu3 }
 0x32d   :  { %764 = vmatmul.msk.f32.vlgmr.msra.gmra.mxu3 %vm49_vm0, %v303_v19 }
 0x334   :  { %v329_v20 = vpop.f32.mrf.mxu3 }
 0x335   :  { %v332_v21 = vmul.f32 0.125, %v329_v20  ;;  %v772_v20 = vld [vmem:[%s1225_s3 + $0x60] sm:$0xff] }
 0x336   :  { %584 = vmatpush.msrb.mxu0 %v772_v20 }
 0x337   :  { %v333_v22 = vsel %vm268_vm13, %v332_v21, -inf }
 0x338   :  { %334 = vmax.xlane.f32.xlu2 %v333_v22 }
 0x350   :  { %344 = vrot.lane.b32.xlu2 %v239_v5, %s881_s15 }
 0x3ab   :  { %v335_v14 = vpop.xlane.xlu2 %334 }
 0x3ac   :  { %v336_v23 = vsub.f32 %v332_v21, %v335_v14  ;;  %v771_v14 = vld [vmem:[%s1225_s3 + $0x58] sm:$0xff] }
 0x3ad   :  { %585 = vmatpush.msrb.mxu0 %v771_v14 }
 0x3ae   :  { %v337_v24 = vmul.f32 1.442695, %v336_v23  ;;  %v770_v23 = vld [vmem:[%s1225_s3 + $0x50] sm:$0xff] }
 0x3af   :  { %586 = vmatpush.msrb.mxu0 %v770_v23 }
 0x3b0   :  { %809 = vpow2.f32 %v337_v24  ;;  %v404_v30 = vpop.f32.mrf.mxu3 }
 0x3b1   :  { %v405_v31 = vadd.f32 %v1057_v28, %v404_v30  ;;  %v768_v30 = vld [vmem:[%s1225_s3 + $0x40] sm:$0xff] }
 0x3b3   :  { %v345_v25 = vpop.permute.xlu2 %344  ;;  %v410_v32 = vsel %vm49_vm0, %v405_v31, 0.0  ;;  %v418_v33 = vmul.f32 %v405_v31, %v405_v31 }
 0x3b4   :  { %365 = vmatpush.msrb.mxu2 %v345_v25 }
 0x3b5   :  { %v420_v34 = vsel %vm49_vm0, %v418_v33, 0.0  ;;  %v613_v33 = vld [vmem:[%s1226_s4 + $0x78] sm:$0xff] }
 0x3b6   :  { %v810_v26 = vpop.eup %809  ;;  %487 = vmatpush.msra.mxu2 %v470_v36  ;;  %616 = vmatpush.msrb.mxu1 %v613_v33 }
 0x3b7   :  { %v339_v29 = vsel %vm268_vm13, %v810_v26, 0.0 }
 0x3b8   :  { %340 = vadd.xlane.f32.xlu0 %v339_v29  ;;  %488 = vmatpush.msra.mxu2 %v469_v37 }
 0x3ba   :  { %489 = vmatpush.msra.mxu2 %v468_v39  ;;  %v611_v39 = vld [vmem:[%s1226_s4 + $0x68] sm:$0xff] }
 0x3bc   :  { %490 = vmatpush.msra.mxu2 %v467_v40 }
 0x3be   :  { %491 = vmatpush.msra.mxu2 %v466_v44  ;;  %v609_v44 = vld [vmem:[%s1226_s4 + $0x58] sm:$0xff] }
 0x3c0   :  { %411 = vadd.xlane.f32.xlu0 %v410_v32  ;;  %492 = vmatpush.msra.mxu2 %v465_v45 }
 0x3c2   :  { %493 = vmatpush.msra.mxu2 %v464_v46  ;;  %v608_v46 = vld [vmem:[%s1226_s4 + $0x50] sm:$0xff] }
 0x3c4   :  { %494 = vmatpush.msra.mxu2 %v463_v47 }
 0x3c8   :  { %421 = vadd.xlane.f32.xlu0 %v420_v34  ;;  %v612_v34 = vld [vmem:[%s1226_s4 + $0x70] sm:$0xff] }
 0x3c9   :  { %617 = vmatpush.msrb.mxu1 %v612_v34 }
 0x3cb   :  { %618 = vmatpush.msrb.mxu1 %v611_v39 }
 0x42b   :  { %v341_v35 = vpop.xlane.xlu0 %340 }
 0x42c   :  { %811 = vrcp.f32 %v341_v35 }
 0x432   :  { %v812_v41 = vpop.eup %811 }
 0x433   :  { %v412_v42 = vpop.xlane.xlu0 %411  ;;  %v343_v43 = vmul.f32 %v812_v41, %v810_v26  ;;  %v610_v41 = vld [vmem:[%s1226_s4 + $0x60] sm:$0xff] }
 0x434   :  { %v416_v48 = vmul.f32 %v412_v42, %v964_v27  ;;  %619 = vmatpush.msrb.mxu1 %v610_v41 }
 0x435   :  { %763 = vmatmul.msk.f32.vlgmr.msrb.gmra.mxu2 %vm268_vm13, %v343_v43 }
 0x436   :  { %v428_v50 = vmul.f32 %v416_v48, %v416_v48  ;;  %v454_v59 = vsub.f32 %v405_v31, %v416_v48  ;;  %620 = vmatpush.msrb.mxu1 %v609_v44  ;;  %v607_v48 = vld [vmem:[%s1226_s4 + $0x48] sm:$0xff] }
 0x438   :  { %621 = vmatpush.msrb.mxu1 %v608_v46 }
 0x43a   :  { %622 = vmatpush.msrb.mxu1 %v607_v48 }
 0x43b   :  { %v422_v49 = vpop.xlane.xlu0 %421 }
 0x43c   :  { %v426_v51 = vmul.f32 %v422_v49, %v964_v27 }
 0x43e   :  { %v430_v52 = vsub.f32 %v426_v51, %v428_v50  ;;  %v606_v50 = vld [vmem:[%s1226_s4 + $0x40] sm:$0xff] }
 0x43f   :  { %623 = vmatpush.msrb.mxu1 %v606_v50  ;;  %v699_v50 = vld [vmem:[#allocation2 + $0xf8] sm:$0xff] }
 0x440   :  { %v432_v53 = vadd.f32 1e-05, %v430_v52  ;;  %716 = vmatpush.msrb.mxu3 %v699_v50 }
 0x442   :  { %813 = vrsqrt.f32 %v432_v53  ;;  %vm440_vm1 = vweird.f32 %v432_v53 }
 0x448   :  { %v814_v54 = vpop.eup %813 }
 0x449   :  { %v435_v55 = vmul.f32 %v814_v54, %v432_v53  ;;  %vm441_vm15 = vweird.f32 %v814_v54  ;;  %v605_v53 = vld [vmem:[%s1226_s4 + $0x38] sm:$0xff] }
 0x44a   :  { %vm442_vm2 = vmor %vm440_vm1, %vm441_vm15  ;;  %624 = vmatpush.msrb.mxu1 %v605_v53  ;;  %v696_v53 = vld [vmem:[#allocation2 + $0xe0] sm:$0xff] }
 0x44b   :  { %v436_v38 = vmul.f32 %v814_v54, %v435_v55 }
 0x44d   :  { %v437_v56 = vmul.f32 0.5, %v436_v38 }
 0x44f   :  { %v438_v57 = vsub.f32 1.5, %v437_v56  ;;  %v604_v56 = vld [vmem:[%s1226_s4 + $0x30] sm:$0xff] }
 0x450   :  { %625 = vmatpush.msrb.mxu1 %v604_v56  ;;  %v692_v56 = vld [vmem:[#allocation2 + $0xc0] sm:$0xff] }
 0x451   :  { %v439_v58 = vmul.f32 %v814_v54, %v438_v57 }
 0x453   :  { %v443_v60 = vsel %vm442_vm2, %v814_v54, %v439_v58 }
 0x454   :  { %v456_v62 = vmul.f32 %v454_v59, %v443_v60  ;;  %v603_v60 = vld [vmem:[%s1226_s4 + $0x28] sm:$0xff] }
 0x455   :  { %626 = vmatpush.msrb.mxu1 %v603_v60 }
 0x456   :  { %v458_v63 = vmul.f32 %v991_v61, %v456_v62 }
 0x458   :  { %v460_v2 = vadd.f32 %v997_v3, %v458_v63 }
 0x45a   :  { %766 = vmatmul.msk.f32.vlgmr.msra.gmra.mxu2 %vm49_vm0, %v460_v2 }
 0x4b8   :  { %v367_v4 = vpop.f32.mrf.mxu2 }
 0x4b9   :  { %765 = vmatmul.msk.f32.gmra.mxu3 %vm49_vm0, %v367_v4 }
 0x4dd   :  { %v496_v5 = vpop.f32.mrf.mxu2 }
 0x4de   :  { %v497_v6 = vadd.f32 %v1073_v0, %v496_v5 }
 0x4e0   :  { %v1076_v7 = vadd.f32 %v497_v6, %v460_v2  ;;  %v602_v2 = vld [vmem:[%s1226_s4 + $0x20] sm:$0xff] }
 0x4e1   :  { %627 = vmatpush.msrb.mxu1 %v602_v2 }
 0x4e2   :  { %v504_v8 = vsel %vm49_vm0, %v1076_v7, 0.0  ;;  %v512_v15 = vmul.f32 %v1076_v7, %v1076_v7 }
 0x4e3   :  { %505 = vadd.xlane.f32.xlu2 %v504_v8 }
 0x4e4   :  { %v514_v16 = vsel %vm49_vm0, %v512_v15, 0.0  ;;  %v599_v15 = vld [vmem:[%s1226_s4 + $0x8] sm:$0xff] }
 0x53c   :  { %v407_v1 = vpop.f32.mrf.mxu3 }
 0x53d   :  { %v1081_v9 = vadd.f32 %v1057_v28, %v407_v1  ;;  %v769_v28 = vld [vmem:[%s1225_s3 + $0x48] sm:$0xff] }
 0x53e   :  { %587 = vmatpush.msrb.mxu0 %v769_v28 }
 0x53f   :  { %v413_v10 = vsel %vm49_vm0, %v1081_v9, 0.0  ;;  %v419_v11 = vmul.f32 %v1081_v9, %v1081_v9 }
 0x540   :  { %414 = vadd.xlane.f32.xlu1 %v413_v10  ;;  %588 = vmatpush.msrb.mxu0 %v768_v30 }
 0x541   :  { %v423_v12 = vsel %vm49_vm0, %v419_v11, 0.0 }
 0x542   :  { %424 = vadd.xlane.f32.xlu0 %v423_v12  ;;  %v601_v12 = vld [vmem:[%s1226_s4 + $0x18] sm:$0xff] }
 0x543   :  { %628 = vmatpush.msrb.mxu1 %v601_v12 }
 0x54a   :  { %515 = vadd.xlane.f32.xlu0 %v514_v16  ;;  %v598_v16 = vld [vmem:[%s1226_s4] sm:$0xff] }
 0x556   :  { %v506_v26 = vpop.xlane.xlu2 %505 }
 0x557   :  { %v510_v31 = vmul.f32 %v506_v26, %v964_v27 }
 0x559   :  { %v522_v36 = vmul.f32 %v510_v31, %v510_v31  ;;  %v548_v8 = vsub.f32 %v1076_v7, %v510_v31  ;;  %v600_v7 = vld [vmem:[%s1226_s4 + $0x10] sm:$0xff] }
 0x55a   :  { %629 = vmatpush.msrb.mxu1 %v600_v7 }
 0x55c   :  { %630 = vmatpush.msrb.mxu1 %v599_v15 }
 0x55e   :  { %631 = vmatpush.msrb.mxu1 %v598_v16 }
 0x5b3   :  { %v415_v19 = vpop.xlane.xlu1 %414 }
 0x5b4   :  { %v417_v21 = vmul.f32 %v415_v19, %v964_v27 }
 0x5b5   :  { %v425_v22 = vpop.xlane.xlu0 %424 }
 0x5b6   :  { %v429_v24 = vmul.f32 %v417_v21, %v417_v21  ;;  %v427_v25 = vmul.f32 %v425_v22, %v964_v27  ;;  %v455_v38 = vsub.f32 %v1081_v9, %v417_v21 }
 0x5b8   :  { %v431_v29 = vsub.f32 %v427_v25, %v429_v24 }
 0x5ba   :  { %v433_v32 = vadd.f32 1e-05, %v431_v29 }
 0x5bc   :  { %815 = vrsqrt.f32 %v433_v32  ;;  %vm450_vm4 = vweird.f32 %v433_v32 }
 0x5bd   :  { %v516_v35 = vpop.xlane.xlu0 %515 }
 0x5be   :  { %v520_v37 = vmul.f32 %v516_v35, %v964_v27 }
 0x5c0   :  { %v524_v40 = vsub.f32 %v520_v37, %v522_v36 }
 0x5c2   :  { %v816_v42 = vpop.eup %815  ;;  %v526_v43 = vadd.f32 1e-05, %v524_v40 }
 0x5c3   :  { %v445_v45 = vmul.f32 %v816_v42, %v433_v32  ;;  %vm451_vm3 = vweird.f32 %v816_v42 }
 0x5c4   :  { %817 = vrsqrt.f32 %v526_v43  ;;  %vm452_vm5 = vmor %vm450_vm4, %vm451_vm3  ;;  %vm534_vm7 = vweird.f32 %v526_v43 }
 0x5c5   :  { %v446_v47 = vmul.f32 %v816_v42, %v445_v45 }
 0x5c7   :  { %v447_v49 = vmul.f32 0.5, %v446_v47 }
 0x5c9   :  { %v448_v51 = vsub.f32 1.5, %v447_v49 }
 0x5ca   :  { %v818_v52 = vpop.eup %817 }
 0x5cb   :  { %v449_v54 = vmul.f32 %v816_v42, %v448_v51  ;;  %v529_v55 = vmul.f32 %v818_v52, %v526_v43  ;;  %vm535_vm6 = vweird.f32 %v818_v52  ;;  %v698_v51 = vld [vmem:[#allocation2 + $0xf0] sm:$0xff] }
 0x5cc   :  { %vm536_vm8 = vmor %vm534_vm7, %vm535_vm6  ;;  %717 = vmatpush.msrb.mxu3 %v698_v51 }
 0x5cd   :  { %v530_v57 = vmul.f32 %v818_v52, %v529_v55  ;;  %v453_v58 = vsel %vm452_vm5, %v816_v42, %v449_v54  ;;  %v695_v54 = vld [vmem:[#allocation2 + $0xd8] sm:$0xff]  ;;  %v694_v55 = vld [vmem:[#allocation2 + $0xd0] sm:$0xff] }
 0x5ce   :  { %v457_v59 = vmul.f32 %v455_v38, %v453_v58  ;;  %v693_v38 = vld [vmem:[#allocation2 + $0xc8] sm:$0xff] }
 0x5cf   :  { %v531_v62 = vmul.f32 0.5, %v530_v57 }
 0x5d0   :  { %v459_v63 = vmul.f32 %v991_v61, %v457_v59 }
 0x5d1   :  { %v532_v4 = vsub.f32 1.5, %v531_v62 }
 0x5d2   :  { %v461_v5 = vadd.f32 %v997_v3, %v459_v63 }
 0x5d3   :  { %v533_v6 = vmul.f32 %v818_v52, %v532_v4 }
 0x5d4   :  { %767 = vmatmul.msk.f32.gmra.mxu2 %vm49_vm0, %v461_v5 }
 0x5d5   :  { %v537_v1 = vsel %vm536_vm8, %v818_v52, %v533_v6  ;;  %v697_v52 = vld [vmem:[#allocation2 + $0xe8] sm:$0xff] }
 0x5d6   :  { %v550_v9 = vmul.f32 %v548_v8, %v537_v1  ;;  %718 = vmatpush.msrb.mxu3 %v697_v52 }
 0x5d8   :  { %v552_v10 = vmul.f32 %v991_v61, %v550_v9  ;;  %719 = vmatpush.msrb.mxu3 %v696_v53 }
 0x5da   :  { %v554_v11 = vadd.f32 %v997_v3, %v552_v10  ;;  %720 = vmatpush.msrb.mxu3 %v695_v54 }
 0x5dc   :  { %776 = vmatmul.msk.f32.vlgmr.msrb.gmra.mxu0 %vm49_vm0, %v554_v11  ;;  %721 = vmatpush.msrb.mxu3 %v694_v55 }
 0x5de   :  { %722 = vmatpush.msrb.mxu3 %v693_v38 }
 0x5e0   :  { %723 = vmatpush.msrb.mxu3 %v692_v56 }
 0x657   :  { %v499_v17 = vpop.f32.mrf.mxu2 }
 0x658   :  { %v500_v18 = vadd.f32 %v1073_v0, %v499_v17  ;;  %v1188_v0 = vld [vmem:[%s1227_s5 + $0x3] ss:$0 sm:$0xff] }
 0x659   :  { %v590_v19 = vpop.f32.mrf.mxu0 }
 0x65a   :  { %v503_v20 = vadd.f32 %v500_v18, %v461_v5  ;;  %v591_v21 = vadd.f32 %v1178_v13, %v590_v19  ;;  %v794_v19 = vld [vmem:[%s1227_s5 + $0x4] ss:$0 sm:$0xff]  ;;  %s882_s5 = smov [#allocation5]  }
 0x65b   :  { %s739_s22 = sshll.u32 %s882_s5, 4  ;;  %s740_s22 = int_to_ptr.vmem [resolvable:$true] %s739_s22 }
 0x65c   :  { %v596_v22 = vmax.f32 %v591_v21, 0.0  ;;  %v507_v14 = vsel %vm49_vm0, %v503_v20, 0.0  ;;  %v513_v23 = vmul.f32 %v503_v20, %v503_v20 }
 0x65d   :  { %508 = vadd.xlane.f32.xlu0 %v507_v14 }
 0x65e   :  { %632 = vmatmul.f32.vlgmr.msrb.gmra.mxu1 %v596_v22  ;;  %v517_v24 = vsel %vm49_vm0, %v513_v23, 0.0 }
 0x665   :  { %518 = vadd.xlane.f32.xlu0 %v517_v24 }
 0x6d0   :  { %v509_v25 = vpop.xlane.xlu0 %508 }
 0x6d1   :  { %v511_v26 = vmul.f32 %v509_v25, %v964_v27 }
 0x6d3   :  { %v523_v29 = vmul.f32 %v511_v26, %v511_v26  ;;  %v549_v45 = vsub.f32 %v503_v20, %v511_v26 }
 0x6d8   :  { %v519_v28 = vpop.xlane.xlu0 %518 }
 0x6d9   :  { %v521_v30 = vmul.f32 %v519_v28, %v964_v27 }
 0x6db   :  { %v525_v31 = vsub.f32 %v521_v30, %v523_v29  ;;  %v633_v32 = vpop.f32.mrf.mxu1 }
 0x6dc   :  { %v634_v33 = vadd.f32 %v1188_v0, %v633_v32 }
 0x6dd   :  { %v527_v34 = vadd.f32 1e-05, %v525_v31 }
 0x6de   :  { %v639_v35 = vsel %vm49_vm0, %v634_v33, 0.0  ;;  %v647_v36 = vmul.f32 %v634_v33, %v634_v33 }
 0x6df   :  { %819 = vrsqrt.f32 %v527_v34  ;;  %640 = vadd.xlane.f32.xlu0 %v639_v35  ;;  %vm544_vm10 = vweird.f32 %v527_v34 }
 0x6e0   :  { %v649_v37 = vsel %vm49_vm0, %v647_v36, 0.0 }
 0x6e1   :  { %650 = vadd.xlane.f32.xlu1 %v649_v37 }
 0x6e5   :  { %v820_v39 = vpop.eup %819 }
 0x6e6   :  { %v539_v40 = vmul.f32 %v820_v39, %v527_v34  ;;  %vm545_vm9 = vweird.f32 %v820_v39 }
 0x6e7   :  { %vm546_vm11 = vmor %vm544_vm10, %vm545_vm9 }
 0x6e8   :  { %v540_v41 = vmul.f32 %v820_v39, %v539_v40 }
 0x6ea   :  { %v541_v42 = vmul.f32 0.5, %v540_v41 }
 0x6ec   :  { %v542_v43 = vsub.f32 1.5, %v541_v42 }
 0x6ee   :  { %v543_v44 = vmul.f32 %v820_v39, %v542_v43 }
 0x6f0   :  { %v547_v46 = vsel %vm546_vm11, %v820_v39, %v543_v44 }
 0x6f1   :  { %v551_v47 = vmul.f32 %v549_v45, %v547_v46 }
 0x6f3   :  { %v553_v48 = vmul.f32 %v991_v61, %v551_v47 }
 0x6f5   :  { %v555_v49 = vadd.f32 %v997_v3, %v553_v48 }
 0x6f7   :  { %777 = vmatmul.msk.f32.gmra.mxu0 %vm49_vm0, %v555_v49 }
 0x752   :  { %v641_v57 = vpop.xlane.xlu0 %640 }
 0x753   :  { %v645_v58 = vmul.f32 %v641_v57, %v964_v27 }
 0x754   :  { %v651_v59 = vpop.xlane.xlu1 %650 }
 0x755   :  { %v657_v60 = vmul.f32 %v645_v58, %v645_v58  ;;  %v655_v62 = vmul.f32 %v651_v59, %v964_v27  ;;  %v683_v10 = vsub.f32 %v634_v33, %v645_v58 }
 0x757   :  { %v659_v63 = vsub.f32 %v655_v62, %v657_v60 }
 0x759   :  { %v661_v2 = vadd.f32 1e-05, %v659_v63 }
 0x75b   :  { %821 = vrsqrt.f32 %v661_v2  ;;  %vm669_vm13 = vweird.f32 %v661_v2 }
 0x761   :  { %v822_v4 = vpop.eup %821 }
 0x762   :  { %v664_v5 = vmul.f32 %v822_v4, %v661_v2  ;;  %vm670_vm12 = vweird.f32 %v822_v4 }
 0x763   :  { %vm671_vm14 = vmor %vm669_vm13, %vm670_vm12 }
 0x764   :  { %v665_v6 = vmul.f32 %v822_v4, %v664_v5 }
 0x766   :  { %v666_v8 = vmul.f32 0.5, %v665_v6 }
 0x768   :  { %v667_v1 = vsub.f32 1.5, %v666_v8 }
 0x76a   :  { %v668_v9 = vmul.f32 %v822_v4, %v667_v1 }
 0x76c   :  { %v672_v11 = vsel %vm671_vm14, %v822_v4, %v668_v9 }
 0x76d   :  { %v685_v12 = vmul.f32 %v683_v10, %v672_v11 }
 0x76f   :  { %v687_v7 = vmul.f32 %v991_v61, %v685_v12 }
 0x771   :  { %v689_v15 = vadd.f32 %v997_v3, %v687_v7 }
 0x773   :  { %778 = vmatmul.msk.f32.vlgmr.msrb.gmra.mxu3 %vm49_vm0, %v689_v15 }
 0x774   :  { %v593_v16 = vpop.f32.mrf.mxu0 }
 0x775   :  { %v594_v17 = vadd.f32 %v1178_v13, %v593_v16 }
 0x777   :  { %v597_v18 = vmax.f32 %v594_v17, 0.0 }
 0x779   :  { %635 = vmatmul.f32.gmra.mxu1 %v597_v18 }
 0x7f6   :  { %v636_v20 = vpop.f32.mrf.mxu1  ;;  %v725_v21 = vpop.f32.mrf.mxu3 }
 0x7f7   :  { %v637_v22 = vadd.f32 %v1188_v0, %v636_v20  ;;  %v726_v14 = vadd.f32 %v794_v19, %v725_v21 }
 0x7f9   :  { %v731_v23 = vadd.f32 %v726_v14, %v689_v15  ;;  %v642_v24 = vsel %vm49_vm0, %v637_v22, 0.0  ;;  %v648_v25 = vmul.f32 %v637_v22, %v637_v22 }
 0x7fa   :  { %643 = vadd.xlane.f32.xlu0 %v642_v24 }
 0x7fb   :  { %733 = vst.msk [vmem:[#allocation5] sm:$0xff] %vm49_vm0, %v731_v23  ;;  %v652_v13 = vsel %vm49_vm0, %v648_v25, 0.0 }
 0x7fc   :  { %653 = vadd.xlane.f32.xlu2 %v652_v13 }
 0x86d   :  { %v644_v26 = vpop.xlane.xlu0 %643 }
 0x86e   :  { %v646_v28 = vmul.f32 %v644_v26, %v964_v27 }
 0x86f   :  { %v654_v29 = vpop.xlane.xlu2 %653 }
 0x870   :  { %v658_v30 = vmul.f32 %v646_v28, %v646_v28  ;;  %v656_v31 = vmul.f32 %v654_v29, %v964_v27  ;;  %v684_v40 = vsub.f32 %v637_v22, %v646_v28 }
 0x872   :  { %v660_v32 = vsub.f32 %v656_v31, %v658_v30 }
 0x874   :  { %v662_v0 = vadd.f32 1e-05, %v660_v32 }
 0x876   :  { %823 = vrsqrt.f32 %v662_v0  ;;  %vm679_vm1 = vweird.f32 %v662_v0 }
 0x87c   :  { %v824_v33 = vpop.eup %823 }
 0x87d   :  { %v674_v34 = vmul.f32 %v824_v33, %v662_v0  ;;  %vm680_vm15 = vweird.f32 %v824_v33 }
 0x87e   :  { %vm681_vm2 = vmor %vm679_vm1, %vm680_vm15 }
 0x87f   :  { %v675_v35 = vmul.f32 %v824_v33, %v674_v34 }
 0x881   :  { %v676_v36 = vmul.f32 0.5, %v675_v35 }
 0x883   :  { %v677_v37 = vsub.f32 1.5, %v676_v36 }
 0x885   :  { %v678_v39 = vmul.f32 %v824_v33, %v677_v37 }
 0x887   :  { %v682_v41 = vsel %vm681_vm2, %v824_v33, %v678_v39 }
 0x888   :  { %v686_v42 = vmul.f32 %v684_v40, %v682_v41 }
 0x88a   :  { %v688_v43 = vmul.f32 %v991_v61, %v686_v42 }
 0x88c   :  { %v690_v44 = vadd.f32 %v997_v3, %v688_v43 }
 0x88e   :  { %779 = vmatmul.msk.f32.gmra.mxu3 %vm49_vm0, %v690_v44 }
 0x911   :  { %v728_v27 = vpop.f32.mrf.mxu3 }
 0x912   :  { %v729_v45 = vadd.f32 %v794_v19, %v728_v27 }
 0x914   :  { %v732_v46 = vadd.f32 %v729_v45, %v690_v44 }
 0x916   :  { %734 = vst.msk [vmem:[#allocation5 + $0x8] sm:$0xff] %vm49_vm0, %v732_v46 }
 0x917   :  { %747 = dma.vmem_to_hbm [thread:$0]  %s740_s22, 256, %s742_s25, [#allocation4], %s878_s29, %s878_s29, %s879_s30  }
 0x918   :  { %875 = dma.done.wait [#allocation4], 256  }
 0x919   :  { %876 = vsyncadd [#allocation4], 4294967040 }
 0x91a   :  { %752 = vsyncpa [#allocation3], 1 }
 0x91b   :  { %753 = vsyncpa [#allocation4], 1 }

</bundles_post_ra>
